<compile_context>
chip_gen: v6e
topology: v6e:2x2x1
jax: 0.10.0
libtpu: 0.0.40
codegen_flags: <defaults>
</compile_context>

<pallas_src>
import functools

import jax
import jax.numpy as jnp
from jax.experimental import pallas as pl
from jax.experimental.pallas import tpu as pltpu

_LANE = 128       # lane width: output feature dims padded to multiples of this
_ROW_ALIGN = 16   # bf16 packs 2 rows per sublane -> 16-row aligned tiles


def _round_up(x, m):
    return ((x + m - 1) // m) * m


def _vmem_capacity_bytes():
    """Physical VMEM of the current chip; conservative 64 MiB if unknown."""
    try:
        info = pltpu.get_tpu_info()
        cap = getattr(info, "vmem_capacity_bytes", None)
        if cap:
            return int(cap)
    except Exception:
        pass
    return 64 * 1024 * 1024


# --------------------------------------------------------------------------- #
# Fused kernel: whole MLP on one (tm, D0) row tile; weights resident in VMEM. #
# --------------------------------------------------------------------------- #
def _mlp_fused_kernel(*refs, n_layers, compute_dtype):
    """refs = (x_ref, w0, b0, w1, b1, ..., w_{L-1}, b_{L-1}, o_ref).

    Every layer: y = x @ W + b (bf16 matmul, f32 accumulate, f32 bias),
    ReLU on all layers except the last.  Intermediates never touch HBM.
    """
    x_ref = refs[0]
    o_ref = refs[-1]
    wb = refs[1:-1]

    h = x_ref[...]                       # already compute_dtype (bf16)
    for l in range(n_layers):
        w = wb[2 * l][...]               # (Kp, Np), bf16
        b = wb[2 * l + 1][...]           # (1, Np), f32
        lhs = h if h.dtype == compute_dtype else h.astype(compute_dtype)
        y = jnp.dot(lhs, w, preferred_element_type=jnp.float32)
        y = y + b                        # f32 epilogue
        if l < n_layers - 1:
            y = jnp.maximum(y, 0.0)
        h = y
    o_ref[...] = h.astype(o_ref.dtype)


# --------------------------------------------------------------------------- #
# Fallback: per-layer tiled matmul + bias (+ReLU) with f32 VMEM accumulator.  #
# Used only when resident weights would not fit VMEM (e.g. huge dims on v7x). #
# --------------------------------------------------------------------------- #
def _linear_kernel(x_ref, w_ref, b_ref, o_ref, acc_ref, *, apply_relu):
    @pl.when(pl.program_id(2) == 0)
    def _():
        acc_ref[...] = jnp.zeros_like(acc_ref)

    acc_ref[...] += jnp.dot(x_ref[...], w_ref[...],
                            preferred_element_type=jnp.float32)

    @pl.when(pl.program_id(2) == pl.num_programs(2) - 1)
    def _():
        y = acc_ref[...] + b_ref[...]
        if apply_relu:
            y = jnp.maximum(y, 0.0)
        o_ref[...] = y.astype(o_ref.dtype)


def _linear_pallas(x, w, b, *, apply_relu, out_dtype, compute_dtype, vmem_cap):
    M, K = x.shape
    N = w.shape[1]
    tm = min(256, _round_up(M, _ROW_ALIGN))
    tn = min(512, _round_up(N, _LANE))
    tk = min(512, _round_up(K, _LANE))
    M_pad, K_pad, N_pad = _round_up(M, tm), _round_up(K, tk), _round_up(N, tn)

    x_p = jnp.zeros((M_pad, K_pad), compute_dtype).at[:M, :K].set(
        x.astype(compute_dtype))
    w_p = jnp.zeros((K_pad, N_pad), compute_dtype).at[:K, :N].set(
        w.astype(compute_dtype))
    b_p = jnp.zeros((1, N_pad), jnp.float32).at[0, :N].set(
        b.astype(jnp.float32))

    grid = (M_pad // tm, N_pad // tn, K_pad // tk)
    out = pl.pallas_call(
        functools.partial(_linear_kernel, apply_relu=apply_relu),
        out_shape=jax.ShapeDtypeStruct((M_pad, N_pad), out_dtype),
        grid=grid,
        in_specs=[pl.BlockSpec((tm, tk), lambda i, j, k: (i, k)),
                  pl.BlockSpec((tk, tn), lambda i, j, k: (k, j)),
                  pl.BlockSpec((1, tn), lambda i, j, k: (0, j))],
        out_specs=pl.BlockSpec((tm, tn), lambda i, j, k: (i, j)),
        scratch_shapes=[pltpu.VMEM((tm, tn), jnp.float32)],
        compiler_params=pltpu.CompilerParams(
            dimension_semantics=("parallel", "parallel", "arbitrary"),
            vmem_limit_bytes=int(min(0.85 * vmem_cap, 110 * 1024 * 1024))),
    )(x_p, w_p, b_p)
    return out[:M, :N]


def _mlp_layered(params, x, *, compute_dtype, vmem_cap):
    # TODO(synk): v7x could additionally store weights in fp8 to halve VMEM/HBM.
    n_layers = len(params)
    h = x
    for l, (w, b) in enumerate(params):
        last = (l == n_layers - 1)
        h = _linear_pallas(
            h, w, b, apply_relu=not last,
            out_dtype=(x.dtype if last else compute_dtype),
            compute_dtype=compute_dtype, vmem_cap=vmem_cap)
    return h


# --------------------------------------------------------------------------- #
# Public wrapper                                                              #
# --------------------------------------------------------------------------- #
def mlp_forward(params, x, *, tm=None, compute_dtype=jnp.bfloat16):
    """Fused Pallas MLP forward.

    params: list of (w, b) with w: (fan_in, fan_out) f32, b: (fan_out,) f32
            (w is the transpose of torch's nn.Linear.weight).
    x:      (batch, dims[0]) f32.
    """
    M, D0 = x.shape
    n_layers = len(params)
    d_out_last = params[-1][0].shape[1]

    vmem_cap = _vmem_capacity_bytes()
    small_vmem = vmem_cap <= 64 * 1024 * 1024      # v7x-like: 64 MiB, 2 TCs

    # Padded K/N per layer.  Layer 0 keeps the REAL input width (no wrapper pad
    # of x); every later K equals the previous layer's lane-padded N.
    pad_out = [_round_up(w.shape[1], _LANE) for (w, _) in params]
    pad_in = [D0] + pad_out[:-1]
    max_np = max(pad_out)

    # Resident bytes: single-buffered bf16 weights + f32 bias rows.
    resident_bytes = sum(pad_in[l] * pad_out[l] * 2 + pad_out[l] * 4
                         for l in range(n_layers))

    def _vmem_est(t):
        act = 3 * t * max_np * 4                          # ~2 live f32 acts + bf16 copy
        io = 2 * t * D0 * 2 + 2 * t * pad_out[-1] * 4     # 2x-buffered in/out tiles
        return resident_bytes + act + io

    budget = int(0.55 * vmem_cap)                         # headroom for compiler scratch
    if _vmem_est(_ROW_ALIGN) > budget:
        # Weights-resident design does not fit this chip's VMEM: tiled fallback.
        return _mlp_layered(params, x, compute_dtype=compute_dtype,
                            vmem_cap=vmem_cap)

    # ---- row tile: big on single-TC v5e/v6e; >=2 balanced tiles on v7x ------
    if tm is None:
        if small_vmem:
            tm = min(512, max(_ROW_ALIGN, _round_up(-(-M // 2), _ROW_ALIGN)))
        else:
            tm = min(1024, _round_up(M, _ROW_ALIGN))
    tm_eff = max(_ROW_ALIGN,
                 _round_up(min(tm, _round_up(M, _ROW_ALIGN)), _ROW_ALIGN))
    while tm_eff > _ROW_ALIGN and _vmem_est(tm_eff) > budget:
        tm_eff = max(_ROW_ALIGN, _round_up(tm_eff // 2, _ROW_ALIGN))
    M_pad = _round_up(M, tm_eff)

    # ---- input: bf16, real feature width; pad batch only if needed ----------
    x_c = x.astype(compute_dtype)
    if M_pad != M:
        x_c = jnp.zeros((M_pad, D0), compute_dtype).at[:M].set(x_c)

    inputs = [x_c]
    in_specs = [pl.BlockSpec((tm_eff, D0), lambda i: (i, 0))]
    for l, (w, b) in enumerate(params):
        kp, np_ = pad_in[l], pad_out[l]
        if (kp, np_) == w.shape:
            w_p = w.astype(compute_dtype)
        else:
            w_p = (jnp.zeros((kp, np_), compute_dtype)
                   .at[:w.shape[0], :w.shape[1]].set(w.astype(compute_dtype)))
        b_p = (jnp.zeros((1, np_), jnp.float32)
               .at[0, :b.shape[0]].set(b.astype(jnp.float32)))
        inputs += [w_p, b_p]
        # Constant index_map -> single buffer (no wasteful double-buffering).
        in_specs += [
            pl.BlockSpec((kp, np_), lambda i: (0, 0),
                         pipeline_mode=pl.Buffered(1)),
            pl.BlockSpec((1, np_), lambda i: (0, 0),
                         pipeline_mode=pl.Buffered(1)),
        ]

    out_spec = pl.BlockSpec((tm_eff, pad_out[-1]), lambda i: (i, 0))
    grid = (M_pad // tm_eff,)

    # ---- generation-aware VMEM limit ----------------------------------------
    vmem_est = _vmem_est(tm_eff)
    vmem_limit = None
    if vmem_est > 12 * 1024 * 1024:
        cap = int(min(0.85 * vmem_cap, 110 * 1024 * 1024))   # ~54 MiB v7x, ~108 MiB v5e/v6e
        vmem_limit = min(int(vmem_est * 3 // 2), cap)

    # ---- advisory cost estimate ----------------------------------------------
    flops = sum(2 * M_pad * pad_in[l] * pad_out[l] for l in range(n_layers))
    bytes_accessed = (x_c.size * x_c.dtype.itemsize
                      + sum(a.size * a.dtype.itemsize for a in inputs[1:])
                      + M_pad * pad_out[-1] * jnp.dtype(x.dtype).itemsize)

    kernel = functools.partial(_mlp_fused_kernel,
                               n_layers=n_layers,
                               compute_dtype=compute_dtype)

    out_p = pl.pallas_call(
        kernel,
        out_shape=jax.ShapeDtypeStruct((M_pad, pad_out[-1]), x.dtype),
        grid=grid,
        in_specs=in_specs,
        out_specs=out_spec,
        compiler_params=pltpu.CompilerParams(
            dimension_semantics=("parallel",),
            vmem_limit_bytes=vmem_limit,
        ),
        cost_estimate=pl.CostEstimate(
            flops=flops, transcendentals=0, bytes_accessed=bytes_accessed),
    )(*inputs)

    # Lane-dense padded output; one slice back to the real width.
    return out_p[:M, :d_out_last]


# --------------------------------------------------------------------------- #
# Parameter init + pure-JAX reference                                         #
# --------------------------------------------------------------------------- #
def init_mlp_params(key, dims, dtype=jnp.float32):
    """Mirror the PyTorch layer list (incl. the extra final Linear(d_last, d_last)).
    Uses U(-1/sqrt(fan_in), 1/sqrt(fan_in)) like torch.nn.Linear's default."""
    layer_dims = [(dims[l], dims[l + 1]) for l in range(len(dims) - 1)]
    layer_dims.append((dims[-1], dims[-1]))      # final extra linear, no act
    params = []
    for (fan_in, fan_out) in layer_dims:
        key, kw, kb = jax.random.split(key, 3)
        bound = 1.0 / (fan_in ** 0.5)
        w = jax.random.uniform(kw, (fan_in, fan_out), dtype, -bound, bound)
        b = jax.random.uniform(kb, (fan_out,), dtype, -bound, bound)
        params.append((w, b))
    return params


def mlp_forward_ref(params, x, compute_dtype=jnp.bfloat16):
    """Pure-JAX reference with identical bf16-matmul / f32-accumulate semantics."""
    n_layers = len(params)
    h = x
    for i, (w, b) in enumerate(params):
        y = jnp.dot(h.astype(compute_dtype), w.astype(compute_dtype),
                    preferred_element_type=jnp.float32) + b
        if i < n_layers - 1:
            y = jnp.maximum(y, 0.0)
        h = y
    return h


if __name__ == "__main__":
    key = jax.random.PRNGKey(0)
    # Same layer structure as the torch module: Linear(32,64)+ReLU,
    # Linear(64,32)+ReLU, Linear(32,32) (no activation).
    dims = (32, 64, 32)
    batch = 64

    kx, kp = jax.random.split(key)
    x = jax.random.normal(kx, (batch, dims[0]), jnp.float32)
    params = init_mlp_params(kp, dims)

    out = mlp_forward(params, x)          # generation-aware tm / vmem defaults
    out = jax.block_until_ready(out)

    ref = mlp_forward_ref(params, x)
    assert out.shape == (batch, dims[-1])
    assert jnp.allclose(out, ref, atol=2e-3, rtol=2e-3), "mismatch vs reference"

    # TODO(synk): dropout (p_drop > 0) not implemented; module defaults to p_drop=0.0.
    print("KERNEL_OK")
</pallas_src>

<mosaic_0001>
module attributes {stable_mosaic.version = 11 : i64} {
  func.func @_mlp_fused_kernel(%arg0: i32, %arg1: memref<32x32xbf16, #tpu.memory_space<vmem>>, %arg2: memref<32x128xbf16, #tpu.memory_space<vmem>>, %arg3: memref<1x128xf32, #tpu.memory_space<vmem>>, %arg4: memref<128x128xbf16, #tpu.memory_space<vmem>>, %arg5: memref<1x128xf32, #tpu.memory_space<vmem>>, %arg6: memref<128x128xbf16, #tpu.memory_space<vmem>>, %arg7: memref<1x128xf32, #tpu.memory_space<vmem>>, %arg8: memref<32x128xf32, #tpu.memory_space<vmem>>) attributes {dimension_semantics = [#tpu.dimension_semantics<parallel>], iteration_bounds = array<i64: 2>, scalar_prefetch = 0 : i64, scratch_operands = 0 : i64, tpu.core_type = #tpu.core_type<tc>, window_params = [{transform_indices = @transform_0, window_bounds = array<i64: 32, 32>}, {pipeline_mode = #tpu.pipeline_mode<synchronous>, transform_indices = @transform_1, window_bounds = array<i64: 32, 128>}, {pipeline_mode = #tpu.pipeline_mode<synchronous>, transform_indices = @transform_2, window_bounds = array<i64: 1, 128>}, {pipeline_mode = #tpu.pipeline_mode<synchronous>, transform_indices = @transform_3, window_bounds = array<i64: 128, 128>}, {pipeline_mode = #tpu.pipeline_mode<synchronous>, transform_indices = @transform_4, window_bounds = array<i64: 1, 128>}, {pipeline_mode = #tpu.pipeline_mode<synchronous>, transform_indices = @transform_5, window_bounds = array<i64: 128, 128>}, {pipeline_mode = #tpu.pipeline_mode<synchronous>, transform_indices = @transform_6, window_bounds = array<i64: 1, 128>}, {transform_indices = @transform_7, window_bounds = array<i64: 32, 128>}]} {
    %c0 = arith.constant 0 : index
    %c0_0 = arith.constant 0 : index
    %0 = vector.load %arg1[%c0, %c0_0] : memref<32x32xbf16, #tpu.memory_space<vmem>>, vector<32x32xbf16>
    %c0_1 = arith.constant 0 : index
    %c0_2 = arith.constant 0 : index
    %1 = vector.load %arg2[%c0_1, %c0_2] : memref<32x128xbf16, #tpu.memory_space<vmem>>, vector<32x128xbf16>
    %c0_3 = arith.constant 0 : index
    %c0_4 = arith.constant 0 : index
    %2 = vector.load %arg3[%c0_3, %c0_4] : memref<1x128xf32, #tpu.memory_space<vmem>>, vector<1x128xf32>
    %cst = arith.constant dense<0.000000e+00> : vector<32x128xf32>
    %3 = tpu.matmul %0, %1, %cst {dimension_numbers = #tpu.dot_dimension_numbers<[1], [0], [0], [1], [0, 0, 1, 1], [], []>} : vector<32x32xbf16>, vector<32x128xbf16>, vector<32x128xf32> -> vector<32x128xf32>
    %4 = vector.broadcast %2 : vector<1x128xf32> to vector<32x128xf32>
    %5 = arith.addf %3, %4 : vector<32x128xf32>
    %cst_5 = arith.constant 0.000000e+00 : f32
    %6 = vector.broadcast %cst_5 : f32 to vector<32x128xf32>
    %7 = arith.maximumf %5, %6 : vector<32x128xf32>
    %c0_6 = arith.constant 0 : index
    %c0_7 = arith.constant 0 : index
    %8 = vector.load %arg4[%c0_6, %c0_7] : memref<128x128xbf16, #tpu.memory_space<vmem>>, vector<128x128xbf16>
    %c0_8 = arith.constant 0 : index
    %c0_9 = arith.constant 0 : index
    %9 = vector.load %arg5[%c0_8, %c0_9] : memref<1x128xf32, #tpu.memory_space<vmem>>, vector<1x128xf32>
    %10 = arith.truncf %7 : vector<32x128xf32> to vector<32x128xbf16>
    %cst_10 = arith.constant dense<0.000000e+00> : vector<32x128xf32>
    %11 = tpu.matmul %10, %8, %cst_10 {dimension_numbers = #tpu.dot_dimension_numbers<[1], [0], [0], [1], [0, 0, 1, 1], [], []>} : vector<32x128xbf16>, vector<128x128xbf16>, vector<32x128xf32> -> vector<32x128xf32>
    %12 = vector.broadcast %9 : vector<1x128xf32> to vector<32x128xf32>
    %13 = arith.addf %11, %12 : vector<32x128xf32>
    %cst_11 = arith.constant 0.000000e+00 : f32
    %14 = vector.broadcast %cst_11 : f32 to vector<32x128xf32>
    %15 = arith.maximumf %13, %14 : vector<32x128xf32>
    %c0_12 = arith.constant 0 : index
    %c0_13 = arith.constant 0 : index
    %16 = vector.load %arg6[%c0_12, %c0_13] : memref<128x128xbf16, #tpu.memory_space<vmem>>, vector<128x128xbf16>
    %c0_14 = arith.constant 0 : index
    %c0_15 = arith.constant 0 : index
    %17 = vector.load %arg7[%c0_14, %c0_15] : memref<1x128xf32, #tpu.memory_space<vmem>>, vector<1x128xf32>
    %18 = arith.truncf %15 : vector<32x128xf32> to vector<32x128xbf16>
    %cst_16 = arith.constant dense<0.000000e+00> : vector<32x128xf32>
    %19 = tpu.matmul %18, %16, %cst_16 {dimension_numbers = #tpu.dot_dimension_numbers<[1], [0], [0], [1], [0, 0, 1, 1], [], []>} : vector<32x128xbf16>, vector<128x128xbf16>, vector<32x128xf32> -> vector<32x128xf32>
    %20 = vector.broadcast %17 : vector<1x128xf32> to vector<32x128xf32>
    %21 = arith.addf %19, %20 : vector<32x128xf32>
    %c0_17 = arith.constant 0 : index
    %c0_18 = arith.constant 0 : index
    %22 = vector.load %arg8[%c0_17, %c0_18] : memref<32x128xf32, #tpu.memory_space<vmem>>, vector<32x128xf32>
    tpu.vector_store %arg8[%c0_17, %c0_18], %21 {strides = array<i32>} : memref<32x128xf32, #tpu.memory_space<vmem>>, vector<32x128xf32>,
    return
  }
  func.func @transform_0(%arg0: i32) -> (i32, i32) {
    %c0_i32 = arith.constant 0 : i32
    %c0_i32_0 = arith.constant 0 : i32
    return %arg0, %c0_i32 : i32, i32
  }
  func.func @transform_1(%arg0: i32) -> (i32, i32) {
    %c0_i32 = arith.constant 0 : i32
    %c0_i32_0 = arith.constant 0 : i32
    %c0_i32_1 = arith.constant 0 : i32
    return %c0_i32, %c0_i32_0 : i32, i32
  }
  func.func @transform_2(%arg0: i32) -> (i32, i32) {
    %c0_i32 = arith.constant 0 : i32
    %c0_i32_0 = arith.constant 0 : i32
    %c0_i32_1 = arith.constant 0 : i32
    return %c0_i32, %c0_i32_0 : i32, i32
  }
  func.func @transform_3(%arg0: i32) -> (i32, i32) {
    %c0_i32 = arith.constant 0 : i32
    %c0_i32_0 = arith.constant 0 : i32
    %c0_i32_1 = arith.constant 0 : i32
    return %c0_i32, %c0_i32_0 : i32, i32
  }
  func.func @transform_4(%arg0: i32) -> (i32, i32) {
    %c0_i32 = arith.constant 0 : i32
    %c0_i32_0 = arith.constant 0 : i32
    %c0_i32_1 = arith.constant 0 : i32
    return %c0_i32, %c0_i32_0 : i32, i32
  }
  func.func @transform_5(%arg0: i32) -> (i32, i32) {
    %c0_i32 = arith.constant 0 : i32
    %c0_i32_0 = arith.constant 0 : i32
    %c0_i32_1 = arith.constant 0 : i32
    return %c0_i32, %c0_i32_0 : i32, i32
  }
  func.func @transform_6(%arg0: i32) -> (i32, i32) {
    %c0_i32 = arith.constant 0 : i32
    %c0_i32_0 = arith.constant 0 : i32
    %c0_i32_1 = arith.constant 0 : i32
    return %c0_i32, %c0_i32_0 : i32, i32
  }
  func.func @transform_7(%arg0: i32) -> (i32, i32) {
    %c0_i32 = arith.constant 0 : i32
    %c0_i32_0 = arith.constant 0 : i32
    return %arg0, %c0_i32 : i32, i32
  }
}

</mosaic_0001>

<bundles_post_ra>
// kernel: tpu_custom_call.1
= control target key start
LH: loop header
LB: loop body
LE: loop exit
PB: predicated region body
PF: predicated region fallthrough
CT: control target
= control target key end

     0   :  { %12 = vsyncpa [#allocation3], 0  ;;  %s1282_s0 = inlined_call_operand.vmem [shape: bf16[64,32], index: 0, kind: input, shape index: {}]   ;;  %s1283_s1 = inlined_call_operand.vmem [shape: bf16[32,128], index: 1, kind: input, shape index: {}]   ;;  %s1284_s2 = inlined_call_operand.vmem [shape: f32[1,128], index: 2, kind: input, shape index: {}]   ;;  %s1285_s3 = inlined_call_operand.hbm [shape: bf16[128,128], index: 3, kind: input, shape index: {}]   ;;  %s1286_s4 = inlined_call_operand.vmem [shape: f32[1,128], index: 4, kind: input, shape index: {}]   ;;  %s1287_s5 = inlined_call_operand.hbm [shape: bf16[128,128], index: 5, kind: input, shape index: {}]   ;;  %s1288_s6 = inlined_call_operand.vmem [shape: f32[1,128], index: 6, kind: input, shape index: {}]   ;;  %s1289_s7 = inlined_call_operand.hbm [shape: f32[64,128], index: 7, kind: output, shape index: {}]  }
   0x1   :  { %13 = vsyncpa [#allocation6], 0 }
   0x2   :  { %14 = vsyncpa [#allocation4], 0 }
   0x3   :  { %16 = vsyncpa [#allocation4 + $0x1], 0  ;;  %s1125_s24 = smov 0   ;;  %s1127_s25 = smov 0  }
   0x4   :  { %s1129_s26 = smov 0   ;;  %s1131_s27 = smov 0  }
   0x5 LB: > { %s1146_s28 = sadd.s32 4294967295, %s1076_s27   ;;  %s758_s29 = sadd.s32 4294967294, %s1076_s27   ;;  %s1076_s27 = sphi %s1131_s27, %s1303_s27   ;;  %s1072_s26 = sphi %s1129_s26, %s1302_s26   ;;  %s1068_s25 = sphi %s1127_s25, %s1301_s25   ;;  %s1064_s24 = sphi %s1125_s24, %s1300_s24  }
   0x6   : > { %s1150_s30 = sadd.s32 1, %s1076_s27   ;;  %s181_s8 = sadd.s32 1, %s1072_s26 }
   0x7   : > { %s178_s9 = ssub.s32 %s1076_s27, %s1150_s30  ;;  %p191_p0 = scmp.ne.s32.totalorder %s1072_s26, %s1068_s25 }
   0x8   : > { %p179_p1 = scmp.eq.s32.totalorder %s178_s9, 0  ;;  %p192_p2 = scmp.eq.s32.totalorder %s1146_s28, 1 }
   0x9   : > { %p197_p3 = scmp.ne.s32.totalorder %s1068_s25, %s1064_s24  ;;  %p198_p4 = scmp.eq.s32.totalorder %s758_s29, 1 }
   0xa   : > { %s1161_s10 = scalar_select %p179_p1, %s1072_s26, %s181_s8  }
   0xb   : > { %p1163_p5 = por %p192_p2, %p191_p0  ;;  %p1167_p6 = por %p198_p4, %p197_p3 }
   0xc   : > { %p759_p7 = scmp.ge.s32.totalorder %s1076_s27, 1  ;;  %p205_p8 = scmp.lt.s32.totalorder %s1076_s27, 3 }
   0xd   : > { %s1292_s12 = scalar_select %p1167_p6, 1, 0 }
   0xe   : > { %p1290_p9 = scmp.eq.s32.totalorder %s1146_s28, 0  ;;  %p1174_p10 = pnand %p759_p7, %p205_p8 }
   0xf   : > { %s1078_s14 = smov [#allocation2]   ;;  %s1079_s17 = smov [#allocation5]  }
  0x10   : > { %s223_s15 = sshll.u32 %s1078_s14, 4  ;;  %p882_p11 = pneg %p1174_p10  ;;  %s224_s15 = int_to_ptr.vmem [resolvable:$true] %s223_s15 }
  0x11   : > { %s239_s18 = sshll.u32 %s1079_s17, 4  ;;  %s967_s19 = scalar_lea.vmem %s224_s15, 1024  ;;  %s240_s18 = int_to_ptr.vmem [resolvable:$true] %s239_s18 }
  0x12   : > { %p1182_p12 = pnand %p1290_p9, %p882_p11  ;;  %p968_p0 = scmp.ne.s32.totalorder %s224_s15, %s967_s19 }
  0x13   : > { %p975_p3 = scmp.lt.s32.totalorder %s224_s15, %s224_s15  ;;  %p976_p4 = scmp.lt.s32.totalorder %s967_s19, %s967_s19 }
  0x14   : > { %p958_p13 = pneg %p1182_p12 }
  0x15   : > { %p977_p7 = por %p976_p4, %p975_p3 }
  0x16   : > { %p970_p1 = pnand %p968_p0, %p958_p13 }
  0x18   : > { %p971_p2 = pneg %p970_p1 }
  0x1a   : > { %p978_p8 = pnand %p977_p7, %p971_p2 }
  0x1c   : > { %981 = shalt.err (!%p978_p8)
}
  0x1d   : > { %s1080_s20 = smov 64   ;;  %s1081_s21 = smov 4  }
  0x1e   : > { %885 = dma.hbm_to_vmem [thread:$0]  (!%p1182_p12), %s1285_s3, 1024, %s224_s15, [#allocation3], %s1080_s20, %s1080_s20, %s1081_s21  }
  0x1f   : > { %s993_s29 = scalar_lea.vmem %s240_s18, 1024  ;;  %p1001_p9 = scmp.lt.s32.totalorder %s240_s18, %s240_s18 }
  0x20   : > { %p994_p11 = scmp.ne.s32.totalorder %s240_s18, %s993_s29  ;;  %p1002_p6 = scmp.lt.s32.totalorder %s993_s29, %s993_s29 }
  0x22   : > { %p996_p0 = pnand %p994_p11, %p958_p13  ;;  %p1003_p3 = por %p1002_p6, %p1001_p9 }
  0x24   : > { %p997_p1 = pneg %p996_p0 }
  0x26   : > { %p1004_p2 = pnand %p1003_p3, %p997_p1 }
  0x28   : > { %1007 = shalt.err (!%p1004_p2)
}
  0x29   : > { %888 = dma.hbm_to_vmem [thread:$0]  (!%p1182_p12), %s1287_s5, 1024, %s240_s18, [#allocation6], %s1080_s20, %s1080_s20, %s1081_s21  }
  0x2a   : > { %267 = sbr.rel (%p1174_p10) target bundleno = 687 (0x2af), region = 48  ;;  %p1295_p4 = scmp.eq.s32.totalorder (!%p1174_p10), %s1146_s28, 0 }
  0x2f   : > { %1051 = dma.done.wait (%p1295_p4), [#allocation3], 1024   ;;  %p1296_p13 = pmov %p1295_p4 }
  0x30   : > { %p1297_p7 = pmov %p1295_p4 }
  0x31   : > { %1053 = vsyncadd (%p1296_p13), [#allocation3], 4294966272 }
  0x32   : > { %1055 = dma.done.wait (%p1297_p7), [#allocation6], 1024   ;;  %p1298_p6 = pmov %p1295_p4 }
  0x33   : > { %s767_s14 = sshll.u32 %s1146_s28, 2  ;;  %v936_v0 = vld [vmem:[%s1283_s1 + $0x8] sm:$0xff]   ;;  %v937_v1 = vld [vmem:[%s1283_s1] sm:$0xff]   ;;  %vm348_vm0 = vcmask 261120   ;;  %v940_v3 = vld [vmem:[#allocation2 + $0x38] sm:$0xff]   ;;  %s300_s9 = sand.u32 1, %s1068_s25  }
  0x34   : > { %1057 = vsyncadd (%p1298_p6), [#allocation6], 4294966272  ;;  %p304_p9 = scmp.lt.s32.totalorder %s767_s14, 7  ;;  %824 = vmatprep.subr.bf16.mxu0 %v936_v0  ;;  %v941_v4 = vld [vmem:[#allocation2 + $0x30] sm:$0xff]   ;;  %832 = vmatprep.subr.bf16.mxu1 %v940_v3  ;;  %v942_v6 = vld [vmem:[#allocation2 + $0x28] sm:$0xff]   ;;  %s799_s18 = sshll.u32 %s1146_s28, 9 }
  0x35   : > { %825 = vmatpush3.bf16.msra.mxu0 %v936_v0  ;;  %833 = vmatpush3.bf16.msra.mxu1 %v940_v3  ;;  %v943_v7 = vld [vmem:[#allocation2 + $0x20] sm:$0xff]   ;;  %v944_v8 = vld [vmem:[#allocation2 + $0x18] sm:$0xff]   ;;  %v945_v9 = vld [vmem:[#allocation2 + $0x10] sm:$0xff]   ;;  %s1240_s21 = scalar_lea.hbm %s1289_s7, %s799_s18  ;;  %s1242_s22 = scalar_lea.sflag [#allocation4], %s300_s9 }
  0x36   : > { %s1305_s14 = smov (!%p304_p9, %s767_s14), 7  ;;  %826 = vmatprep.subr.bf16.mxu0 %v937_v1  ;;  %834 = vmatprep.subr.bf16.mxu1 %v941_v4  ;;  %v946_v10 = vld [vmem:[#allocation2 + $0x8] sm:$0xff]   ;;  %v947_v11 = vld [vmem:[#allocation2] sm:$0xff]   ;;  %v948_v12 = vld [vmem:[#allocation5 + $0x38] sm:$0xff]   ;;  %s1082_s23 = smov [#allocation7]  }
  0x37   : > { %s768_s15 = sshll.u32 %s1305_s14, 2  ;;  %v949_v13 = vld [vmem:[#allocation5 + $0x30] sm:$0xff]   ;;  %v950_v14 = vld [vmem:[#allocation5 + $0x28] sm:$0xff]   ;;  %v951_v15 = vld [vmem:[#allocation5 + $0x20] sm:$0xff]   ;;  %s766_s14 = sshll.u32 %s300_s9, 5 }
  0x38   : > { %s307_s17 = scalar_lea.vmem %s1282_s0, %s768_s15  ;;  %v952_v16 = vld [vmem:[#allocation5 + $0x18] sm:$0xff]   ;;  %v769_v19 = vld [vmem:[%s1284_s2] ss:$0 sm:$0xff]  ;;  %v953_v32 = vld [vmem:[#allocation5 + $0x10] sm:$0xff]   ;;  %s302_s13 = scalar_lea.vmem [#allocation7], %s766_s14 }
  0x39   : > { %v938_v2 = vld [vmem:[%s307_s17] sm:$0xff]   ;;  %v939_v5 = vld [vmem:[%s307_s17 + $0x8] sm:$0xff]   ;;  %827 = vmatpush3.bf16.msra.mxu0 %v937_v1  ;;  %835 = vmatpush3.bf16.msra.mxu1 %v941_v4  ;;  %s674_s17 = sshll.u32 %s302_s13, 4  ;;  %s1012_s29 = sshll.u32 %s1082_s23, 4  ;;  %s1235_s17 = int_to_ptr.vmem [resolvable:$true] %s674_s17  ;;  %s1013_s29 = int_to_ptr.vmem [resolvable:$false] %s1012_s29 }
  0x3a   : > { %828 = vmatprep.mubr.msk.bf16.mxu0 %vm348_vm0, %v938_v2  ;;  %836 = vmatprep.subr.bf16.mxu1 %v942_v6  ;;  %v954_v33 = vld [vmem:[#allocation5 + $0x8] sm:$0xff]   ;;  %v955_v34 = vld [vmem:[#allocation5] sm:$0xff]   ;;  %s1008_s28 = scalar_lea.vmem %s1235_s17, 512  ;;  %s1014_s8 = scalar_lea.vmem %s1013_s29, 1024 }
  0x3b   : > { %852 = vmatprep.subr.bf16.mxu0 %v948_v12  ;;  %v776_v37 = vld [vmem:[%s1286_s4] ss:$0 sm:$0xff]  ;;  %p1009_p10 = scmp.ne.s32.totalorder %s1235_s17, %s1008_s28  ;;  %p1015_p11 = scmp.lt.s32.totalorder %s1235_s17, %s1013_s29 }
  0x3c   : > { %829 = vmatmul.mubr.msk.bf16.vlgmr.msra.gmra.mxu0 %vm348_vm0, %v939_v5  ;;  %v785_v50 = vld [vmem:[%s1288_s6] ss:$0 sm:$0xff]  ;;  %p1016_p0 = scmp.lt.s32.totalorder %s1014_s8, %s1008_s28 }
  0x3d   : > { %837 = vmatpush3.bf16.msra.mxu1 %v942_v6  ;;  %853 = vmatpush3.bf16.msra.mxu0 %v948_v12  ;;  %p1010_p12 = pnand %p1009_p10, %p1163_p5 }
  0x3e   : > { %838 = vmatprep.subr.bf16.mxu1 %v943_v7  ;;  %854 = vmatprep.subr.bf16.mxu0 %v949_v13  ;;  %p1017_p1 = por %p1016_p0, %p1015_p11 }
  0x3f   : > { %p1011_p8 = pneg %p1010_p12 }
  0x41   : > { %839 = vmatpush3.bf16.msra.mxu1 %v943_v7  ;;  %855 = vmatpush3.bf16.msra.mxu0 %v949_v13  ;;  %p1018_p3 = pnand %p1017_p1, %p1011_p8 }
  0x42   : > { %840 = vmatprep.subr.bf16.mxu1 %v944_v8  ;;  %856 = vmatprep.subr.bf16.mxu0 %v950_v14 }
  0x45   : > { %841 = vmatpush3.bf16.msra.mxu1 %v944_v8  ;;  %857 = vmatpush3.bf16.msra.mxu0 %v950_v14 }
  0x46   : > { %842 = vmatprep.subr.bf16.mxu1 %v945_v9  ;;  %858 = vmatprep.subr.bf16.mxu0 %v951_v15 }
  0x49   : > { %843 = vmatpush3.bf16.msra.mxu1 %v945_v9  ;;  %859 = vmatpush3.bf16.msra.mxu0 %v951_v15 }
  0x4a   : > { %844 = vmatprep.subr.bf16.mxu1 %v946_v10  ;;  %860 = vmatprep.subr.bf16.mxu0 %v952_v16 }
  0x4d   : > { %845 = vmatpush3.bf16.msra.mxu1 %v946_v10  ;;  %861 = vmatpush3.bf16.msra.mxu0 %v952_v16 }
  0x4e   : > { %846 = vmatprep.subr.bf16.mxu1 %v947_v11  ;;  %862 = vmatprep.subr.bf16.mxu0 %v953_v32 }
  0x51   : > { %847 = vmatpush3.bf16.msra.mxu1 %v947_v11  ;;  %863 = vmatpush3.bf16.msra.mxu0 %v953_v32 }
  0x52   : > { %864 = vmatprep.subr.bf16.mxu0 %v954_v33 }
  0x55   : > { %865 = vmatpush3.bf16.msra.mxu0 %v954_v33 }
  0x56   : > { %866 = vmatprep.subr.bf16.mxu0 %v955_v34 }
  0x59   : > { %867 = vmatpush3.bf16.msra.mxu0 %v955_v34 }
  0xfc   : > { %v830_v17 = vpop.f32.mrf.mxu0 }
  0xfd   : > { %v398_v23 = vadd.f32 %v830_v17, %v769_v19 }
  0xfe   : > { %v389_v18 = vpop.f32.mrf.mxu0 }
  0xff   : > { %v390_v21 = vadd.f32 %v769_v19, %v389_v18  ;;  %v406_v29 = vmax.f32 %v398_v23, 0.0 }
 0x100   : > { %v831_v20 = vpop.f32.mrf.mxu0 }
 0x101   : > { %v401_v22 = vadd.f32 %v831_v20, %v769_v19  ;;  %v404_v27 = vmax.f32 %v390_v21, 0.0 }
 0x102   : > { %v392_v24 = vpop.f32.mrf.mxu0 }
 0x103   : > { %v393_v25 = vadd.f32 %v769_v19, %v392_v24  ;;  %v407_v26 = vmax.f32 %v401_v22, 0.0 }
 0x105   : > { %v405_v28 = vmax.f32 %v393_v25, 0.0  ;;  %v426_v31 = vpack.c.bf16 %v407_v26, %v406_v29 }
 0x107   : > { %v425_v30 = vpack.c.bf16 %v405_v28, %v404_v27 }
 0x109   : > { %848 = vmatprep.mubr.bf16.mxu1 %v425_v30 }
 0x10a   : > { %849 = vmatmul.mubr.bf16.vlgmr.msra.gmra.mxu1 %v426_v31 }
 0x1ca   : > { %v850_v35 = vpop.f32.mrf.mxu1 }
 0x1cb   : > { %v524_v41 = vadd.f32 %v850_v35, %v776_v37 }
 0x1cc   : > { %v515_v36 = vpop.f32.mrf.mxu1 }
 0x1cd   : > { %v516_v39 = vadd.f32 %v776_v37, %v515_v36  ;;  %v532_v47 = vmax.f32 %v524_v41, 0.0 }
 0x1ce   : > { %v851_v38 = vpop.f32.mrf.mxu1 }
 0x1cf   : > { %v527_v40 = vadd.f32 %v851_v38, %v776_v37  ;;  %v530_v45 = vmax.f32 %v516_v39, 0.0 }
 0x1d0   : > { %v518_v42 = vpop.f32.mrf.mxu1 }
 0x1d1   : > { %v519_v43 = vadd.f32 %v776_v37, %v518_v42  ;;  %v533_v44 = vmax.f32 %v527_v40, 0.0 }
 0x1d3   : > { %v531_v46 = vmax.f32 %v519_v43, 0.0  ;;  %v552_v49 = vpack.c.bf16 %v533_v44, %v532_v47 }
 0x1d5   : > { %v551_v48 = vpack.c.bf16 %v531_v46, %v530_v45 }
 0x1d7   : > { %868 = vmatprep.mubr.bf16.mxu0 %v551_v48 }
 0x1d8   : > { %869 = vmatmul.mubr.bf16.vlgmr.msra.gmra.mxu0 %v552_v49 }
 0x298   : > { %v870_v51 = vpop.f32.mrf.mxu0 }
 0x299   : > { %v650_v52 = vadd.f32 %v870_v51, %v785_v50 }
 0x29a   : > { %v641_v53 = vpop.f32.mrf.mxu0 }
 0x29b   : > { %658 = vst [vmem:[%s302_s13 + $0x10] sm:$0xff] %v650_v52  ;;  %v642_v54 = vadd.f32 %v785_v50, %v641_v53 }
 0x29c   : > { %v871_v55 = vpop.f32.mrf.mxu0 }
 0x29d   : > { %656 = vst [vmem:[%s302_s13] sm:$0xff] %v642_v54  ;;  %v653_v56 = vadd.f32 %v871_v55, %v785_v50 }
 0x29e   : > { %v644_v57 = vpop.f32.mrf.mxu0 }
 0x29f   : > { %659 = vst [vmem:[%s302_s13 + $0x18] sm:$0xff] %v653_v56  ;;  %v645_v58 = vadd.f32 %v785_v50, %v644_v57 }
 0x2a1   : > { %657 = vst [vmem:[%s302_s13 + $0x8] sm:$0xff] %v645_v58 }
 0x2a2   : > { %1021 = shalt.err (!%p1018_p3)
}
 0x2a3   : > { %s1022_s9 = scalar_lea.hbm %s1240_s21, 512  ;;  %s1026_s16 = scalar_lea.hbm %s1289_s7, 1024 }
 0x2a4   : > { %p1023_p2 = scmp.ne.s32.totalorder %s1240_s21, %s1022_s9  ;;  %p1027_p7 = scmp.lt.s32.totalorder %s1240_s21, %s1289_s7 }
 0x2a5   : > { %p1028_p6 = scmp.lt.s32.totalorder %s1026_s16, %s1022_s9 }
 0x2a6   : > { %p1024_p4 = pnand %p1023_p2, %p1163_p5 }
 0x2a7   : > { %p1029_p9 = por %p1028_p6, %p1027_p7 }
 0x2a8   : > { %p1025_p13 = pneg %p1024_p4 }
 0x2aa   : > { %p1030_p10 = pnand %p1029_p9, %p1025_p13 }
 0x2ac   : > { %1033 = shalt.err (!%p1030_p10)
}
 0x2ad   : > { %s1083_s19 = smov 128   ;;  %s1084_s20 = smov 8  }
 0x2ae   : > { %880 = dma.vmem_to_hbm [thread:$0]  (%p1163_p5), %s1235_s17, 512, %s1240_s21, %s1242_s22, %s1083_s19, %s1083_s19, %s1084_s20  }
 0x2af PF: > { %p897_p12 = scmp.ge.s32.totalorder %s1076_s27, 2  ;;  %s689_s28 = sand.u32 1, %s1064_s24  }
 0x2b0   : > { %p1299_p8 = scmp.ne.s32.totalorder %s1292_s12, 0  ;;  %s690_s23 = scalar_lea.sflag [#allocation4], %s689_s28 }
 0x2b2   : > { %p890_p11 = pnand %p897_p12, %p1299_p8 }
 0x2b4   : > { %p891_p0 = pneg %p890_p11 }
 0x2b6   : > { %1059 = dma.done.wait (%p891_p0), %s690_s23, 512  }
 0x2b7   : > { %1061 = vsyncadd (%p891_p0), %s690_s23, 4294966784  ;;  %p19_p1 = scmp.ge.s32.totalorder %s1150_s30, 4   ;;  %s1300_s24 = smov %s1068_s25 }
 0x2b8   : > { %s1301_s25 = smov %s1072_s26  ;;  %s1302_s26 = smov %s1161_s10 }
 0x2b9   : > { %s1303_s27 = smov %s1150_s30  ;;  %21 = sbr.rel (!%p19_p1) target bundleno = 5 (0x5), region = 92 }
 0x2be   :  { %695 = vsyncpa [#allocation3], 1 }
 0x2bf   :  { %697 = vsyncpa [#allocation3 + $0x1], 1 }
 0x2c0   :  { %698 = vsyncpa [#allocation6], 1 }
 0x2c1   :  { %699 = vsyncpa [#allocation4], 1 }
 0x2c2   :  { %701 = vsyncpa [#allocation4 + $0x1], 1 }

</bundles_post_ra>
